<compile_context>
chip_gen: v5e
topology: v5e:2x2
jax: 0.10.0
libtpu: 0.0.40
codegen_flags: <defaults>
</compile_context>

<pallas_src>
import jax
import jax.numpy as jnp
from jax import lax
from jax.experimental import pallas as pl
from jax.experimental.pallas import tpu as pltpu


def _round_up(x, m):
    return ((x + m - 1) // m) * m


def _alphazero_kernel(x_ref, w1_ref, b1_ref, w2_ref, b2_ref, wht_ref, bht_ref,
                      out_ref):
    # x_ref: [TB, in] f32; w* bf16; b* f32; out_ref: [head_pad, TB] f32.
    x = x_ref[...].astype(jnp.bfloat16)                       # cast on VPU, in-kernel
    h1 = jnp.dot(x, w1_ref[...],
                 preferred_element_type=jnp.float32) + b1_ref[...]
    h1 = jnp.maximum(h1, 0.0)                                 # relu(fc1), f32 epilogue
    h2 = jnp.dot(h1.astype(jnp.bfloat16), w2_ref[...],
                 preferred_element_type=jnp.float32) + b2_ref[...]
    h2 = jnp.maximum(h2, 0.0)                                 # relu(fc2), f32 epilogue
    # Fused policy|value head, transposed so the batch dim is lane-dense:
    #   wht [head_pad, H] (.) h2 [TB, H], contracting H with H -> [head_pad, TB]
    out_t = lax.dot_general(
        wht_ref[...], h2.astype(jnp.bfloat16),
        dimension_numbers=(((1,), (1,)), ((), ())),
        preferred_element_type=jnp.float32)
    out_ref[...] = out_t + bht_ref[...]                       # bias bcast along lanes


def prepare_params(params):
    """One-time weight prep (hoisted out of the forward path).

    Fuses policy+value heads, pads the head dim to a multiple of 8 sublanes,
    stores the fused head transposed ([head_pad, hidden]), and casts matmul
    operands to bf16 (biases stay f32).
    """
    out_dim = params["wp"].shape[1]
    head_dim = out_dim + 1
    head_pad = _round_up(head_dim, 8)                          # f32 sublane tile

    wh = jnp.concatenate([params["wp"], params["wv"]], axis=1)  # [H, out+1]
    bh = jnp.concatenate([params["bp"], params["bv"]], axis=1)  # [1, out+1]
    wh_t = jnp.pad(wh.T, ((0, head_pad - head_dim), (0, 0)))    # [head_pad, H]
    bh_t = jnp.pad(bh.T, ((0, head_pad - head_dim), (0, 0)))    # [head_pad, 1]

    return dict(
        w1=params["w1"].astype(jnp.bfloat16),
        b1=params["b1"].astype(jnp.float32),
        w2=params["w2"].astype(jnp.bfloat16),
        b2=params["b2"].astype(jnp.float32),
        wh_t=wh_t.astype(jnp.bfloat16),
        bh_t=bh_t.astype(jnp.float32),
    )


def _choose_block_b(B, in_dim, head_pad, cap=2048):
    # Keep >=4 grid steps for large B (dual-TC sharding on v7x + pipelining),
    # lane-align (128) the batch tile, and bound the double-buffered f32
    # x/out tiles well under the default scoped-VMEM limits on all generations.
    blk = _round_up(max(1, -(-B // 4)), 128)
    blk = min(blk, cap)
    row_bytes = (in_dim + head_pad) * 4 * 2                    # f32 in + f32 out, x2 buf
    vmem_rows = max(128, ((8 << 20) // row_bytes) // 128 * 128)
    return max(128, min(blk, vmem_rows))


def alphazero_forward(x, prep, out_dim, *, block_b=None):
    """Fused AlphaZero MLP forward.

    x: [B, input_size] float32
    prep: output of prepare_params()
    returns (policy [B, out_dim], value [B, 1]) float32.
    """
    B, in_dim = x.shape
    hidden = prep["w1"].shape[1]
    head_pad = prep["wh_t"].shape[0]

    if block_b is None:
        block_b = _choose_block_b(B, in_dim, head_pad)
    if block_b >= B:
        block_b = B                       # single full block (always layout-legal)
    else:
        block_b = _round_up(block_b, 128)  # lane dim of the transposed output
        if block_b >= B:
            block_b = B
    grid = (pl.cdiv(B, block_b),)

    full = lambda shape: pl.BlockSpec(shape, lambda i: (0, 0))  # resident weights

    flops = 2 * B * (in_dim * hidden + hidden * hidden + hidden * head_pad)
    bytes_accessed = (4 * B * (in_dim + head_pad)
                      + 2 * (in_dim * hidden + hidden * hidden + head_pad * hidden)
                      + 4 * (2 * hidden + head_pad))

    out_t = pl.pallas_call(
        _alphazero_kernel,
        out_shape=jax.ShapeDtypeStruct((head_pad, B), jnp.float32),
        grid_spec=pltpu.PrefetchScalarGridSpec(
            num_scalar_prefetch=0,
            grid=grid,
            in_specs=[
                pl.BlockSpec((block_b, in_dim), lambda i: (i, 0)),   # x (f32)
                full((in_dim, hidden)),                              # w1 bf16
                full((1, hidden)),                                   # b1 f32
                full((hidden, hidden)),                              # w2 bf16
                full((1, hidden)),                                   # b2 f32
                full((head_pad, hidden)),                            # wh_t bf16
                full((head_pad, 1)),                                 # bh_t f32
            ],
            out_specs=pl.BlockSpec((head_pad, block_b), lambda i: (0, i)),
        ),
        compiler_params=pltpu.CompilerParams(
            dimension_semantics=("parallel",)),
        cost_estimate=pl.CostEstimate(flops=int(flops), transcendentals=0,
                                      bytes_accessed=int(bytes_accessed)),
    )(x, prep["w1"], prep["b1"], prep["w2"], prep["b2"],
      prep["wh_t"], prep["bh_t"])

    policy = out_t[:out_dim, :].T                    # [B, out_dim]
    value = out_t[out_dim:out_dim + 1, :].T          # [B, 1]
    return policy, value


def init_params(key, input_size, output_size, hidden=128):
    """torch.nn.Linear-style init (uniform +/- 1/sqrt(fan_in)), weights stored
    transposed to [in_features, out_features]."""
    def linear(k, fan_in, fan_out):
        kw, kb = jax.random.split(k)
        bound = 1.0 / jnp.sqrt(fan_in)
        w = jax.random.uniform(kw, (fan_in, fan_out), jnp.float32, -bound, bound)
        b = jax.random.uniform(kb, (1, fan_out), jnp.float32, -bound, bound)
        return w, b

    k1, k2, k3, k4 = jax.random.split(key, 4)
    w1, b1 = linear(k1, input_size, hidden)
    w2, b2 = linear(k2, hidden, hidden)
    wp, bp = linear(k3, hidden, output_size)
    wv, bv = linear(k4, hidden, 1)
    return dict(w1=w1, b1=b1, w2=w2, b2=b2, wp=wp, bp=bp, wv=wv, bv=bv)


def reference_forward_bf16(x, p):
    """Plain-JAX reference with the same bf16-operand / f32-accumulate recipe."""
    bf = jnp.bfloat16
    h1 = jnp.maximum(
        jnp.dot(x.astype(bf), p["w1"].astype(bf),
                preferred_element_type=jnp.float32) + p["b1"], 0.0)
    h2 = jnp.maximum(
        jnp.dot(h1.astype(bf), p["w2"].astype(bf),
                preferred_element_type=jnp.float32) + p["b2"], 0.0)
    policy = jnp.dot(h2.astype(bf), p["wp"].astype(bf),
                     preferred_element_type=jnp.float32) + p["bp"]
    value = jnp.dot(h2.astype(bf), p["wv"].astype(bf),
                    preferred_element_type=jnp.float32) + p["bv"]
    return policy, value


def reference_forward_f32(x, p):
    h1 = jnp.maximum(x @ p["w1"] + p["b1"], 0.0)
    h2 = jnp.maximum(h1 @ p["w2"] + p["b2"], 0.0)
    return h2 @ p["wp"] + p["bp"], h2 @ p["wv"] + p["bv"]


if __name__ == "__main__":
    input_size, output_size = 32, 16
    batch = 8

    key = jax.random.PRNGKey(0)
    kx, kp = jax.random.split(key)
    x = jax.random.normal(kx, (batch, input_size), jnp.float32)
    params = init_params(kp, input_size, output_size)
    prep = prepare_params(params)              # one-time weight prep (hoisted)

    policy, value = alphazero_forward(x, prep, output_size)
    policy = jax.block_until_ready(policy)
    value = jax.block_until_ready(value)

    assert policy.shape == (batch, output_size)
    assert value.shape == (batch, 1)

    # Tight check against a bf16-operand reference (same numerics recipe).
    ref_p16, ref_v16 = reference_forward_bf16(x, params)
    assert jnp.allclose(policy, ref_p16, atol=1e-2, rtol=1e-2)
    assert jnp.allclose(value, ref_v16, atol=1e-2, rtol=1e-2)

    # Loose check against the full-f32 PyTorch-equivalent reference.
    # NOTE: bf16 matmul operands intentionally deviate from exact f32 torch math.
    ref_p32, ref_v32 = reference_forward_f32(x, params)
    assert jnp.allclose(policy, ref_p32, atol=6e-2, rtol=6e-2)
    assert jnp.allclose(value, ref_v32, atol=6e-2, rtol=6e-2)

    print("KERNEL_OK")
</pallas_src>

<mosaic_0001>
module attributes {stable_mosaic.version = 11 : i64} {
  func.func @_alphazero_kernel(%arg0: i32, %arg1: memref<8x32xf32, #tpu.memory_space<vmem>>, %arg2: memref<32x128xbf16, #tpu.memory_space<vmem>>, %arg3: memref<1x128xf32, #tpu.memory_space<vmem>>, %arg4: memref<128x128xbf16, #tpu.memory_space<vmem>>, %arg5: memref<1x128xf32, #tpu.memory_space<vmem>>, %arg6: memref<24x128xbf16, #tpu.memory_space<vmem>>, %arg7: memref<24x1xf32, #tpu.memory_space<vmem>>, %arg8: memref<24x8xf32, #tpu.memory_space<vmem>>) attributes {dimension_semantics = [#tpu.dimension_semantics<parallel>], iteration_bounds = array<i64: 1>, scalar_prefetch = 0 : i64, scratch_operands = 0 : i64, tpu.core_type = #tpu.core_type<tc>, window_params = [{transform_indices = @transform_0, window_bounds = array<i64: 8, 32>}, {pipeline_mode = #tpu.pipeline_mode<synchronous>, transform_indices = @transform_1, window_bounds = array<i64: 32, 128>}, {pipeline_mode = #tpu.pipeline_mode<synchronous>, transform_indices = @transform_2, window_bounds = array<i64: 1, 128>}, {pipeline_mode = #tpu.pipeline_mode<synchronous>, transform_indices = @transform_3, window_bounds = array<i64: 128, 128>}, {pipeline_mode = #tpu.pipeline_mode<synchronous>, transform_indices = @transform_4, window_bounds = array<i64: 1, 128>}, {pipeline_mode = #tpu.pipeline_mode<synchronous>, transform_indices = @transform_5, window_bounds = array<i64: 24, 128>}, {pipeline_mode = #tpu.pipeline_mode<synchronous>, transform_indices = @transform_6, window_bounds = array<i64: 24, 1>}, {transform_indices = @transform_7, window_bounds = array<i64: 24, 8>}]} {
    %c0 = arith.constant 0 : index
    %c0_0 = arith.constant 0 : index
    %0 = vector.load %arg1[%c0, %c0_0] : memref<8x32xf32, #tpu.memory_space<vmem>>, vector<8x32xf32>
    %1 = arith.truncf %0 : vector<8x32xf32> to vector<8x32xbf16>
    %c0_1 = arith.constant 0 : index
    %c0_2 = arith.constant 0 : index
    %2 = vector.load %arg2[%c0_1, %c0_2] : memref<32x128xbf16, #tpu.memory_space<vmem>>, vector<32x128xbf16>
    %cst = arith.constant dense<0.000000e+00> : vector<8x128xf32>
    %3 = tpu.matmul %1, %2, %cst {dimension_numbers = #tpu.dot_dimension_numbers<[1], [0], [0], [1], [0, 0, 1, 1], [], []>} : vector<8x32xbf16>, vector<32x128xbf16>, vector<8x128xf32> -> vector<8x128xf32>
    %c0_3 = arith.constant 0 : index
    %c0_4 = arith.constant 0 : index
    %4 = vector.load %arg3[%c0_3, %c0_4] : memref<1x128xf32, #tpu.memory_space<vmem>>, vector<1x128xf32>
    %5 = vector.broadcast %4 : vector<1x128xf32> to vector<8x128xf32>
    %6 = arith.addf %3, %5 : vector<8x128xf32>
    %cst_5 = arith.constant 0.000000e+00 : f32
    %7 = vector.broadcast %cst_5 : f32 to vector<8x128xf32>
    %8 = arith.maximumf %6, %7 : vector<8x128xf32>
    %9 = arith.truncf %8 : vector<8x128xf32> to vector<8x128xbf16>
    %c0_6 = arith.constant 0 : index
    %c0_7 = arith.constant 0 : index
    %10 = vector.load %arg4[%c0_6, %c0_7] : memref<128x128xbf16, #tpu.memory_space<vmem>>, vector<128x128xbf16>
    %cst_8 = arith.constant dense<0.000000e+00> : vector<8x128xf32>
    %11 = tpu.matmul %9, %10, %cst_8 {dimension_numbers = #tpu.dot_dimension_numbers<[1], [0], [0], [1], [0, 0, 1, 1], [], []>} : vector<8x128xbf16>, vector<128x128xbf16>, vector<8x128xf32> -> vector<8x128xf32>
    %c0_9 = arith.constant 0 : index
    %c0_10 = arith.constant 0 : index
    %12 = vector.load %arg5[%c0_9, %c0_10] : memref<1x128xf32, #tpu.memory_space<vmem>>, vector<1x128xf32>
    %13 = vector.broadcast %12 : vector<1x128xf32> to vector<8x128xf32>
    %14 = arith.addf %11, %13 : vector<8x128xf32>
    %cst_11 = arith.constant 0.000000e+00 : f32
    %15 = vector.broadcast %cst_11 : f32 to vector<8x128xf32>
    %16 = arith.maximumf %14, %15 : vector<8x128xf32>
    %c0_12 = arith.constant 0 : index
    %c0_13 = arith.constant 0 : index
    %17 = vector.load %arg6[%c0_12, %c0_13] : memref<24x128xbf16, #tpu.memory_space<vmem>>, vector<24x128xbf16>
    %18 = arith.truncf %16 : vector<8x128xf32> to vector<8x128xbf16>
    %cst_14 = arith.constant dense<0.000000e+00> : vector<24x8xf32>
    %19 = tpu.matmul %17, %18, %cst_14 {dimension_numbers = #tpu.dot_dimension_numbers<[1], [1], [0], [0], [0, 0, 1, 0], [], []>} : vector<24x128xbf16>, vector<8x128xbf16>, vector<24x8xf32> -> vector<24x8xf32>
    %c0_15 = arith.constant 0 : index
    %c0_16 = arith.constant 0 : index
    %20 = vector.load %arg7[%c0_15, %c0_16] : memref<24x1xf32, #tpu.memory_space<vmem>>, vector<24x1xf32>
    %21 = vector.broadcast %20 : vector<24x1xf32> to vector<24x8xf32>
    %22 = arith.addf %19, %21 : vector<24x8xf32>
    %c0_17 = arith.constant 0 : index
    %c0_18 = arith.constant 0 : index
    %23 = vector.load %arg8[%c0_17, %c0_18] : memref<24x8xf32, #tpu.memory_space<vmem>>, vector<24x8xf32>
    tpu.vector_store %arg8[%c0_17, %c0_18], %22 {strides = array<i32>} : memref<24x8xf32, #tpu.memory_space<vmem>>, vector<24x8xf32>,
    return
  }
  func.func @transform_0(%arg0: i32) -> (i32, i32) {
    %c0_i32 = arith.constant 0 : i32
    %c0_i32_0 = arith.constant 0 : i32
    return %arg0, %c0_i32 : i32, i32
  }
  func.func @transform_1(%arg0: i32) -> (i32, i32) {
    %c0_i32 = arith.constant 0 : i32
    %c0_i32_0 = arith.constant 0 : i32
    %c0_i32_1 = arith.constant 0 : i32
    return %c0_i32, %c0_i32_0 : i32, i32
  }
  func.func @transform_2(%arg0: i32) -> (i32, i32) {
    %c0_i32 = arith.constant 0 : i32
    %c0_i32_0 = arith.constant 0 : i32
    %c0_i32_1 = arith.constant 0 : i32
    return %c0_i32, %c0_i32_0 : i32, i32
  }
  func.func @transform_3(%arg0: i32) -> (i32, i32) {
    %c0_i32 = arith.constant 0 : i32
    %c0_i32_0 = arith.constant 0 : i32
    %c0_i32_1 = arith.constant 0 : i32
    return %c0_i32, %c0_i32_0 : i32, i32
  }
  func.func @transform_4(%arg0: i32) -> (i32, i32) {
    %c0_i32 = arith.constant 0 : i32
    %c0_i32_0 = arith.constant 0 : i32
    %c0_i32_1 = arith.constant 0 : i32
    return %c0_i32, %c0_i32_0 : i32, i32
  }
  func.func @transform_5(%arg0: i32) -> (i32, i32) {
    %c0_i32 = arith.constant 0 : i32
    %c0_i32_0 = arith.constant 0 : i32
    %c0_i32_1 = arith.constant 0 : i32
    return %c0_i32, %c0_i32_0 : i32, i32
  }
  func.func @transform_6(%arg0: i32) -> (i32, i32) {
    %c0_i32 = arith.constant 0 : i32
    %c0_i32_0 = arith.constant 0 : i32
    %c0_i32_1 = arith.constant 0 : i32
    return %c0_i32, %c0_i32_0 : i32, i32
  }
  func.func @transform_7(%arg0: i32) -> (i32, i32) {
    %c0_i32 = arith.constant 0 : i32
    %c0_i32_0 = arith.constant 0 : i32
    return %c0_i32, %arg0 : i32, i32
  }
}

</mosaic_0001>

<bundles_post_ra>
// kernel: tpu_custom_call.1
= control target key start
LH: loop header
LB: loop body
LE: loop exit
PB: predicated region body
PF: predicated region fallthrough
CT: control target
= control target key end

     0   :  { %12 = vsyncpa [#allocation3], 0  ;;  %s526_s0 = inlined_call_operand.hbm [shape: f32[8,32], index: 0, kind: input, shape index: {}]   ;;  %s527_s1 = inlined_call_operand.vmem [shape: bf16[32,128], index: 1, kind: input, shape index: {}]   ;;  %s528_s2 = inlined_call_operand.hbm [shape: f32[1,128], index: 2, kind: input, shape index: {}]   ;;  %s529_s3 = inlined_call_operand.hbm [shape: bf16[128,128], index: 3, kind: input, shape index: {}]   ;;  %s530_s4 = inlined_call_operand.hbm [shape: f32[1,128], index: 4, kind: input, shape index: {}]   ;;  %s531_s5 = inlined_call_operand.vmem [shape: bf16[24,128], index: 5, kind: input, shape index: {}]   ;;  %s532_s6 = inlined_call_operand.vmem [shape: f32[24,1], index: 6, kind: input, shape index: {}]   ;;  %s533_s7 = inlined_call_operand.vmem [shape: f32[24,8], index: 7, kind: output, shape index: {}]  }
   0x1   :  { %13 = vsyncpa [#allocation5], 0  ;;  %s33_s26 = sshll.u32 %s528_s2, 4  ;;  %s34_s26 = int_to_ptr.hbm [resolvable:$true] %s33_s26 }
   0x2   :  { %14 = vsyncpa [#allocation8], 0  ;;  %s437_s27 = smov [#allocation4]   ;;  %s20_s8 = sshll.u32 %s526_s0, 4  ;;  %s21_s8 = int_to_ptr.hbm [resolvable:$true] %s20_s8 }
   0x3   :  { %s35_s28 = sshll.u32 %s437_s27, 4  ;;  %s438_s9 = smov [#allocation2]   ;;  %s36_s28 = int_to_ptr.vmem [resolvable:$true] %s35_s28 }
   0x4   :  { %38 = dma.hbm_to_vmem [thread:$0]  %s34_s26, 16, %s36_s28, [#allocation5]  }
   0x5   :  { %s22_s10 = sshll.u32 %s438_s9, 4  ;;  %s43_s13 = sshll.u32 %s529_s3, 4  ;;  %s23_s10 = int_to_ptr.vmem [resolvable:$true] %s22_s10  ;;  %s44_s13 = int_to_ptr.hbm [resolvable:$true] %s43_s13 }
   0x6   :  { %25 = dma.hbm_to_vmem [thread:$0]  %s21_s8, 128, %s23_s10, [#allocation3]  }
   0x7   :  { %s439_s2 = smov [#allocation6]   ;;  %s57_s17 = sshll.u32 %s530_s4, 4  ;;  %s58_s17 = int_to_ptr.hbm [resolvable:$true] %s57_s17 }
   0x8   :  { %s45_s14 = sshll.u32 %s439_s2, 4  ;;  %s440_s18 = smov 64   ;;  %s46_s14 = int_to_ptr.vmem [resolvable:$true] %s45_s14 }
   0x9   :  { %s441_s0 = smov 4   ;;  %s442_s19 = smov [#allocation7]  }
   0xa   :  { %51 = dma.hbm_to_vmem [thread:$0]  %s44_s13, 1024, %s46_s14, [#allocation5], %s440_s18, %s440_s18, %s441_s0  }
   0xb   :  { %s59_s20 = sshll.u32 %s442_s19, 4  ;;  %s60_s20 = int_to_ptr.vmem [resolvable:$true] %s59_s20 }
   0xc   :  { %62 = dma.hbm_to_vmem [thread:$0]  %s58_s17, 16, %s60_s20, [#allocation8]  }
   0xd   :  { %431 = dma.done.wait [#allocation3], 128  }
   0xe   :  { %432 = vsyncadd [#allocation3], 4294967168 }
   0xf   :  { %433 = dma.done.wait [#allocation5], 1040  }
  0x10   :  { %434 = vsyncadd [#allocation5], 4294966256 }
  0x11   :  { %435 = dma.done.wait [#allocation8], 16  }
  0x12   :  { %436 = vsyncadd [#allocation8], 4294967280  ;;  %v314_v0 = vld [vmem:[%s527_s1 + $0x8] sm:$0xff]  ;;  %v313_v2 = vld [vmem:[%s527_s1] sm:$0xff]  ;;  %vm106_vm0 = vcmask 261120   ;;  %v443_v18 = vmov 0  }
  0x13   :  { %v322_v1 = vld [vmem:[#allocation6 + $0x38] sm:$0xff]  ;;  %116 = vmatpush.bf16.msra.mxu0 %v314_v0  ;;  %v321_v4 = vld [vmem:[#allocation6 + $0x30] sm:$0xff]  ;;  %v320_v6 = vld [vmem:[#allocation6 + $0x28] sm:$0xff]  ;;  %331 = vset.pattern.permute.xlu0 %v443_v18  ;;  %vm257_vm1 = vcmask 64512  }
  0x14   :  { %v84_v3 = vld [vmem:[#allocation2] sm:$0xff]  ;;  %193 = vmatpush.bf16.msra.mxu1 %v322_v1  ;;  %v319_v7 = vld [vmem:[#allocation6 + $0x20] sm:$0xff]  ;;  %v316_v10 = vld [vmem:[#allocation6 + $0x8] sm:$0xff]  ;;  %332 = vset.pattern.permute.xlu1 %v443_v18 }
  0x15   :  { %v85_v5 = vpack.c.bf16 %v84_v3, %v84_v3  ;;  %v318_v8 = vld [vmem:[#allocation6 + $0x18] sm:$0xff]  ;;  %v317_v9 = vld [vmem:[#allocation6 + $0x10] sm:$0xff]  ;;  %v315_v11 = vld [vmem:[#allocation6] sm:$0xff] }
  0x16   :  { %v333_v12 = vld [vmem:[#allocation4] ss:$0 sm:$0xff]  ;;  %v334_v19 = vld [vmem:[#allocation7] ss:$0 sm:$0xff]  ;;  %v211_v20 = vld [vmem:[%s532_s6] sm:$0xff] }
  0x17   :  { %117 = vmatpush.bf16.msra.mxu0 %v313_v2  ;;  %v213_v21 = vld [vmem:[%s532_s6 + $0x10] sm:$0xff]  ;;  %216 = vperm.xlu0 %331, %v211_v20   ;;  %v212_v25 = vld [vmem:[%s532_s6 + $0x8] sm:$0xff]  ;;  %v323_v28 = vld [vmem:[%s531_s5] sm:$0xff] }
  0x18   :  { %194 = vmatpush.bf16.msra.mxu1 %v321_v4  ;;  %226 = vperm.xlu1 %332, %v213_v21   ;;  %v209_v29 = vld [vmem:[%s531_s5 + $0x8] sm:$0xf] }
  0x19   :  { %v234_v30 = vunpack.c.l.b16 %v209_v29 }
  0x1a   :  { %276 = vmatmul.msk.bf16.vlgmr.msra.gmra.mxu0 %vm106_vm0, %v85_v5 }
  0x1b   :  { %v236_v31 = vpack.c.b16 %v234_v30, %v234_v30 }
  0x1c   :  { %195 = vmatpush.bf16.msra.mxu1 %v320_v6 }
  0x1f   :  { %221 = vperm.xlu0 %331, %v212_v25  }
  0x20   :  { %196 = vmatpush.bf16.msra.mxu1 %v319_v7 }
  0x24   :  { %197 = vmatpush.bf16.msra.mxu1 %v318_v8 }
  0x28   :  { %198 = vmatpush.bf16.msra.mxu1 %v317_v9 }
  0x2c   :  { %199 = vmatpush.bf16.msra.mxu1 %v316_v10 }
  0x30   :  { %200 = vmatpush.bf16.msra.mxu1 %v315_v11 }
  0x89   :  { %v217_v32 = vpop.permute.xlu0 %216 }
  0x8a   :  { %v227_v38 = vpop.permute.xlu1 %226 }
  0x91   :  { %v222_v35 = vpop.permute.xlu0 %221 }
  0x97   :  { %v119_v13 = vpop.f32.mrf.mxu0 }
  0x98   :  { %v120_v14 = vadd.f32 %v333_v12, %v119_v13 }
  0x9a   :  { %v123_v15 = vmax.f32 %v120_v14, 0.0 }
  0x9c   :  { %v124_v16 = vpack.c.bf16 %v123_v15, %v123_v15 }
  0x9e   :  { %201 = vmatmul.bf16.vlgmr.msra.gmra.mxu1 %v124_v16 }
  0x9f   :  { %v121_v17 = vpop.f32.mrf.mxu0 }
 0x11b   :  { %v202_v22 = vpop.f32.mrf.mxu1 }
 0x11c   :  { %v203_v23 = vadd.f32 %v334_v19, %v202_v22 }
 0x11e   :  { %v206_v24 = vmax.f32 %v203_v23, 0.0 }
 0x120   :  { %v210_v26 = vpack.c.bf16 %v206_v24, %v206_v24 }
 0x122   :  { %246 = vmatpush.bf16.xpose.msra.mxu2 %v210_v26 }
 0x123   :  { %v204_v27 = vpop.f32.mrf.mxu1 }
 0x129   :  { %247 = vmatmul.bf16.vlgmr.msra.gmra.mxu2 %v323_v28 }
 0x139   :  { %252 = vmatmul.bf16.gmra.mxu2 %v236_v31 }
 0x1ac   :  { %v248_v33 = vpop.f32.mrf.mxu2 }
 0x1ad   :  { %v249_v34 = vadd.f32 %v248_v33, %v217_v32 }
 0x1af   :  { %258 = vst.msk [vmem:[%s533_s7] sm:$0xff] %vm257_vm1, %v249_v34 }
 0x1b4   :  { %v250_v36 = vpop.f32.mrf.mxu2 }
 0x1b5   :  { %v251_v37 = vadd.f32 %v250_v36, %v222_v35 }
 0x1b7   :  { %259 = vst.msk [vmem:[%s533_s7 + $0x8] sm:$0xff] %vm257_vm1, %v251_v37 }
 0x1bc   :  { %v253_v39 = vpop.f32.mrf.mxu2 }
 0x1bd   :  { %v254_v40 = vadd.f32 %v253_v39, %v227_v38 }
 0x1bf   :  { %260 = vst.msk [vmem:[%s533_s7 + $0x10] sm:$0xff] %vm257_vm1, %v254_v40 }
 0x1c4   :  { %v255_v41 = vpop.f32.mrf.mxu2 }
 0x1c5   :  { %265 = vsyncpa [#allocation3], 1 }
 0x1c6   :  { %266 = vsyncpa [#allocation5], 1 }
 0x1c7   :  { %267 = vsyncpa [#allocation8], 1 }

</bundles_post_ra>
